<compile_context>
chip_gen: v5e
topology: v5e:2x2
jax: 0.10.0
libtpu: 0.0.40
codegen_flags: <defaults>
</compile_context>

<pallas_src>
import functools

import numpy as np
import jax
import jax.numpy as jnp
from jax.experimental import pallas as pl
from jax.experimental.pallas import tpu as pltpu

EPS = 1e-5          # torch.nn.InstanceNorm2d default eps
NEG_SLOPE = 0.2     # LeakyReLU slope


def _pick_row_tile(h_out, w_out):
    """Divisor of h_out; prefer lane-aligned L_tile=d*w_out in [1024, 2048]."""
    hw = h_out * w_out
    if hw <= 2048:
        return h_out                      # single tile
    best, best_key = None, None
    for d in range(1, h_out + 1):
        if h_out % d:
            continue
        l = d * w_out
        if l > 4096:
            continue
        key = (0 if l % 128 == 0 else 1,
               0 if 1024 <= l <= 2048 else 1,
               abs(l - 2048))
        if best_key is None or key < best_key:
            best, best_key = d, key
    if best is None:                      # w_out alone is huge; tile per row
        return 1
    return best


def _unet_down_kernel(x_ref, w_ref, o_ref, y_ref, s_ref, ss_ref, *,
                      n_tiles, l_tile, w_out, hw, normalize):
    # x_ref : (1, 1, 8*C_in, l_tile + w_out)   compute dtype (bf16/f32)
    # w_ref : (2, C_blk, 8*C_in)               compute dtype
    # o_ref : (1, C_blk, hw)                   out dtype, lane-dense, resident in t
    # y_ref : (n_tiles, C_blk, l_tile)         f32 staging scratch
    # s_ref, ss_ref : (C_blk, 1)               f32 stats carry
    t = pl.program_id(2)

    if normalize:
        @pl.when(t == 0)
        def _init():
            s_ref[...] = jnp.zeros_like(s_ref)
            ss_ref[...] = jnp.zeros_like(ss_ref)

    # ---- conv for this row tile: 2 accumulated MXU matmuls ----
    slab = x_ref[0, 0]                        # (8*C_in, l_tile + w_out)
    a0 = slab[:, 0:l_tile]                    # kh in {0, 1} taps
    a1 = slab[:, w_out:w_out + l_tile]        # kh in {2, 3} taps (one view-row down)
    y = jnp.dot(w_ref[0], a0, preferred_element_type=jnp.float32)
    y = y + jnp.dot(w_ref[1], a1, preferred_element_type=jnp.float32)

    if normalize:
        s_ref[...] += jnp.sum(y, axis=1, keepdims=True)
        ss_ref[...] += jnp.sum(y * y, axis=1, keepdims=True)
    else:
        y = jnp.where(y >= 0, y, NEG_SLOPE * y)
    y_ref[t] = y                              # dynamic index on major axis only

    # ---- finalize: InstanceNorm (f32) + LeakyReLU, single lane-dense writeback ----
    @pl.when(t == n_tiles - 1)
    def _finalize():
        if normalize:
            inv_hw = 1.0 / float(hw)
            mean = s_ref[...] * inv_hw
            var = jnp.maximum(ss_ref[...] * inv_hw - mean * mean, 0.0)
            inv_std = jax.lax.rsqrt(var + EPS)
        for k in range(n_tiles):              # static, lane-dense stores
            v = y_ref[k]
            if normalize:
                v = (v - mean) * inv_std
                v = jnp.where(v >= 0, v, NEG_SLOPE * v)
            o_ref[0, :, k * l_tile:(k + 1) * l_tile] = v.astype(o_ref.dtype)


def unet_down(x, weight, *, normalize=True, dropout=0.0,
              compute_dtype=jnp.bfloat16, c_splits=1):
    """x: (N, C_in, H, W); weight: (C_out, C_in, 4, 4) -> (N, C_out, H/2, W/2)."""
    # TODO(synk): training-mode dropout (dropout > 0) not wired into the kernel.
    assert dropout == 0.0

    N, C_in, H, W = x.shape
    C_out = weight.shape[0]
    assert weight.shape == (C_out, C_in, 4, 4)
    assert H % 2 == 0 and W % 2 == 0
    H_out, W_out = H // 2, W // 2
    HW = H_out * W_out
    out_dtype = x.dtype

    TR = _pick_row_tile(H_out, W_out)
    assert H_out % TR == 0
    n_tiles = H_out // TR
    L_tile = TR * W_out

    # C_out split for v7x's 2nd TensorCore; only if the half is 8-aligned.
    if (c_splits < 1 or C_out % c_splits != 0
            or (c_splits > 1 and (C_out // c_splits) % 8 != 0)):
        c_splits = 1
    C_blk = C_out // c_splits

    # ---- prep: parity/phase deinterleave, cast fused, single slab-stack pass ----
    x_pad = jnp.pad(x.astype(compute_dtype), ((0, 0), (0, 0), (1, 1), (1, 1)))
    pieces = []
    for t in range(n_tiles):
        for kw in range(4):
            for p in range(2):                      # view index v = kw*2 + p
                r0 = p + 2 * t * TR
                pieces.append(
                    x_pad[:, :, r0:r0 + 2 * TR + 1:2, kw:kw + 2 * W_out:2])
    # (N, n_tiles*8, C_in, TR+1, W_out) -> contiguity-preserving reshape
    x_til = jnp.stack(pieces, axis=1).reshape(
        N, n_tiles, 8 * C_in, (TR + 1) * W_out)

    # weight halves matching the (kw, kh-parity, c_in) row order of the views
    wt = jnp.transpose(weight, (0, 3, 2, 1)).astype(compute_dtype)  # (C_out, kw, kh, C_in)
    w0 = wt[:, :, 0:2, :].reshape(C_out, 8 * C_in)                  # kh in {0, 1}
    w1 = wt[:, :, 2:4, :].reshape(C_out, 8 * C_in)                  # kh in {2, 3}
    w_both = jnp.stack([w0, w1], axis=0)                            # (2, C_out, 8*C_in)

    kernel = functools.partial(
        _unet_down_kernel, n_tiles=n_tiles, l_tile=L_tile, w_out=W_out,
        hw=HW, normalize=normalize)

    # ---- VMEM budget: per-generation cap, actual block + scratch sizes ----
    isz = np.dtype(compute_dtype).itemsize
    osz = np.dtype(out_dtype).itemsize
    x_blk = 8 * C_in * (L_tile + W_out) * isz
    w_blk = 2 * C_blk * 8 * C_in * isz
    o_blk = C_blk * HW * osz
    y_scr = C_blk * HW * 4
    need = 2 * (x_blk + w_blk + o_blk) + y_scr + (2 << 20)
    try:
        cap = int(pltpu.get_tpu_info().vmem_capacity_bytes) * 3 // 4
    except Exception:
        cap = 48 * 1024 * 1024
    vmem_limit = int(min(max(need, 8 << 20), max(cap, 16 << 20)))

    out = pl.pallas_call(
        kernel,
        out_shape=jax.ShapeDtypeStruct((N, C_out, HW), out_dtype),
        grid_spec=pltpu.PrefetchScalarGridSpec(
            num_scalar_prefetch=0,
            grid=(N, c_splits, n_tiles),
            in_specs=[
                pl.BlockSpec((1, 1, 8 * C_in, L_tile + W_out),
                             lambda n, c, t: (n, t, 0, 0)),
                pl.BlockSpec((2, C_blk, 8 * C_in),
                             lambda n, c, t: (0, c, 0)),
            ],
            out_specs=pl.BlockSpec((1, C_blk, HW),
                                   lambda n, c, t: (n, c, 0)),
            scratch_shapes=[
                pltpu.VMEM((n_tiles, C_blk, L_tile), jnp.float32),
                pltpu.VMEM((C_blk, 1), jnp.float32),
                pltpu.VMEM((C_blk, 1), jnp.float32),
            ],
        ),
        compiler_params=pltpu.CompilerParams(
            dimension_semantics=("parallel", "parallel", "arbitrary"),
            vmem_limit_bytes=vmem_limit),
    )(x_til, w_both)

    # lane-dense (N, C_out, HW) -> NCHW is a free reshape (no transpose, no cast)
    return out.reshape(N, C_out, H_out, W_out)


def _reference(x, weight, normalize=True):
    """Pure-JAX reference for correctness check."""
    y = jax.lax.conv_general_dilated(
        x, weight, window_strides=(2, 2), padding=((1, 1), (1, 1)),
        dimension_numbers=("NCHW", "OIHW", "NCHW"))
    if normalize:
        mean = jnp.mean(y, axis=(2, 3), keepdims=True)
        var = jnp.var(y, axis=(2, 3), keepdims=True)
        y = (y - mean) * jax.lax.rsqrt(var + EPS)
    return jnp.where(y >= 0, y, NEG_SLOPE * y)


if __name__ == "__main__":
    key = jax.random.PRNGKey(0)
    kx, kw = jax.random.split(key)

    # ---- small shape, matches the module spec ----
    N, C_in, C_out, H, W = 2, 4, 16, 16, 16
    x = jax.random.normal(kx, (N, C_in, H, W), dtype=jnp.float32)
    fan_in = C_in * 4 * 4
    weight = jax.random.normal(kw, (C_out, C_in, 4, 4), dtype=jnp.float32) / jnp.sqrt(fan_in)

    ref = _reference(x, weight)

    # f32 MXU path: matches the PyTorch module's default precision.
    out_f32 = jax.block_until_ready(unet_down(x, weight, compute_dtype=jnp.float32))
    assert out_f32.shape == (N, C_out, H // 2, W // 2)
    assert jnp.allclose(out_f32, ref, atol=1e-4, rtol=1e-4)

    # default bf16-fed MXU path (stats / norm still f32): looser numerical check.
    out_bf16 = jax.block_until_ready(unet_down(x, weight))
    assert out_bf16.shape == (N, C_out, H // 2, W // 2)
    assert jnp.allclose(out_bf16, ref, atol=2e-1, rtol=2e-1)

    # normalize=False branch (first UNet layer).
    ref_nf = _reference(x, weight, normalize=False)
    out_nf = jax.block_until_ready(
        unet_down(x, weight, normalize=False, compute_dtype=jnp.float32))
    assert jnp.allclose(out_nf, ref_nf, atol=1e-4, rtol=1e-4)

    # larger spatial: exercises the multi-row-tile grid axis and the C_out-split
    # ("parallel") axis used for v7x's second TensorCore at batch 1.
    N2, H2, W2 = 1, 128, 128
    x2 = jax.random.normal(kx, (N2, C_in, H2, W2), dtype=jnp.float32)
    ref2 = _reference(x2, weight)
    out2 = jax.block_until_ready(
        unet_down(x2, weight, compute_dtype=jnp.float32, c_splits=2))
    assert out2.shape == (N2, C_out, H2 // 2, W2 // 2)
    assert jnp.allclose(out2, ref2, atol=1e-3, rtol=1e-3)

    print("KERNEL_OK")
</pallas_src>

<mosaic_0001>
module attributes {stable_mosaic.version = 11 : i64} {
  func.func @_unet_down_kernel(%arg0: i32, %arg1: i32, %arg2: i32, %arg3: memref<1x1x32x72xf32, #tpu.memory_space<vmem>>, %arg4: memref<2x16x32xf32, #tpu.memory_space<vmem>>, %arg5: memref<1x16x64xf32, #tpu.memory_space<vmem>>, %arg6: memref<1x16x64xf32, #tpu.memory_space<vmem>>, %arg7: memref<16x1xf32, #tpu.memory_space<vmem>>, %arg8: memref<16x1xf32, #tpu.memory_space<vmem>>) attributes {dimension_semantics = [#tpu.dimension_semantics<parallel>, #tpu.dimension_semantics<parallel>, #tpu.dimension_semantics<arbitrary>], iteration_bounds = array<i64: 2, 1, 1>, scalar_prefetch = 0 : i64, scratch_operands = 3 : i64, tpu.core_type = #tpu.core_type<tc>, window_params = [{transform_indices = @transform_0, window_bounds = array<i64: 1, 1, 32, 72>}, {transform_indices = @transform_1, window_bounds = array<i64: 2, 16, 32>}, {transform_indices = @transform_2, window_bounds = array<i64: 1, 16, 64>}]} {
    %c0_i32 = arith.constant 0 : i32
    %0 = arith.cmpi eq, %arg2, %c0_i32 : i32
    %1 = arith.extui %0 : i1 to i32
    %c0_i32_0 = arith.constant 0 : i32
    %2 = arith.cmpi ne, %1, %c0_i32_0 : i32
    scf.if %2 {
      %cst_24 = arith.constant 0.000000e+00 : f32
      %32 = vector.broadcast %cst_24 : f32 to vector<16x1xf32>
      %c0_25 = arith.constant 0 : index
      %c0_26 = arith.constant 0 : index
      %33 = vector.load %arg7[%c0_25, %c0_26] : memref<16x1xf32, #tpu.memory_space<vmem>>, vector<16x1xf32>
      tpu.vector_store %arg7[%c0_25, %c0_26], %32 {strides = array<i32>} : memref<16x1xf32, #tpu.memory_space<vmem>>, vector<16x1xf32>,
      %cst_27 = arith.constant 0.000000e+00 : f32
      %34 = vector.broadcast %cst_27 : f32 to vector<16x1xf32>
      %c0_28 = arith.constant 0 : index
      %c0_29 = arith.constant 0 : index
      %35 = vector.load %arg8[%c0_28, %c0_29] : memref<16x1xf32, #tpu.memory_space<vmem>>, vector<16x1xf32>
      tpu.vector_store %arg8[%c0_28, %c0_29], %34 {strides = array<i32>} : memref<16x1xf32, #tpu.memory_space<vmem>>, vector<16x1xf32>,
    } else {
    }
    %c0 = arith.constant 0 : index
    %c0_1 = arith.constant 0 : index
    %c0_2 = arith.constant 0 : index
    %c0_3 = arith.constant 0 : index
    %3 = vector.load %arg3[%c0, %c0_1, %c0_2, %c0_3] : memref<1x1x32x72xf32, #tpu.memory_space<vmem>>, vector<1x1x32x72xf32>
    %4 = vector.shape_cast %3 : vector<1x1x32x72xf32> to vector<32x72xf32>
    %5 = vector.extract_strided_slice %4 {offsets = [0, 0], sizes = [32, 64], strides = [1, 1]} : vector<32x72xf32> to vector<32x64xf32>
    %6 = vector.extract_strided_slice %4 {offsets = [0, 8], sizes = [32, 64], strides = [1, 1]} : vector<32x72xf32> to vector<32x64xf32>
    %c0_4 = arith.constant 0 : index
    %c0_5 = arith.constant 0 : index
    %c0_6 = arith.constant 0 : index
    %7 = vector.load %arg4[%c0_4, %c0_5, %c0_6] : memref<2x16x32xf32, #tpu.memory_space<vmem>>, vector<1x16x32xf32>
    %8 = vector.shape_cast %7 : vector<1x16x32xf32> to vector<16x32xf32>
    %cst = arith.constant dense<0.000000e+00> : vector<16x64xf32>
    %9 = tpu.matmul %8, %5, %cst {dimension_numbers = #tpu.dot_dimension_numbers<[1], [0], [0], [1], [0, 0, 1, 1], [], []>} : vector<16x32xf32>, vector<32x64xf32>, vector<16x64xf32> -> vector<16x64xf32>
    %c1 = arith.constant 1 : index
    %c0_7 = arith.constant 0 : index
    %c0_8 = arith.constant 0 : index
    %10 = vector.load %arg4[%c1, %c0_7, %c0_8] : memref<2x16x32xf32, #tpu.memory_space<vmem>>, vector<1x16x32xf32>
    %11 = vector.shape_cast %10 : vector<1x16x32xf32> to vector<16x32xf32>
    %cst_9 = arith.constant dense<0.000000e+00> : vector<16x64xf32>
    %12 = tpu.matmul %11, %6, %cst_9 {dimension_numbers = #tpu.dot_dimension_numbers<[1], [0], [0], [1], [0, 0, 1, 1], [], []>} : vector<16x32xf32>, vector<32x64xf32>, vector<16x64xf32> -> vector<16x64xf32>
    %13 = arith.addf %9, %12 : vector<16x64xf32>
    %c0_10 = arith.constant 0 : index
    %c0_11 = arith.constant 0 : index
    %14 = vector.load %arg7[%c0_10, %c0_11] : memref<16x1xf32, #tpu.memory_space<vmem>>, vector<16x1xf32>
    %cst_12 = arith.constant dense<0.000000e+00> : vector<16xf32>
    %15 = vector.multi_reduction <add>, %13, %cst_12 [1] : vector<16x64xf32> to vector<16xf32>
    %16 = vector.shape_cast %15 : vector<16xf32> to vector<16x1xf32>
    %17 = arith.addf %14, %16 : vector<16x1xf32>
    %c0_13 = arith.constant 0 : index
    %c0_14 = arith.constant 0 : index
    %18 = vector.load %arg7[%c0_13, %c0_14] : memref<16x1xf32, #tpu.memory_space<vmem>>, vector<16x1xf32>
    tpu.vector_store %arg7[%c0_13, %c0_14], %17 {strides = array<i32>} : memref<16x1xf32, #tpu.memory_space<vmem>>, vector<16x1xf32>,
    %c0_15 = arith.constant 0 : index
    %c0_16 = arith.constant 0 : index
    %19 = vector.load %arg8[%c0_15, %c0_16] : memref<16x1xf32, #tpu.memory_space<vmem>>, vector<16x1xf32>
    %20 = arith.mulf %13, %13 : vector<16x64xf32>
    %cst_17 = arith.constant dense<0.000000e+00> : vector<16xf32>
    %21 = vector.multi_reduction <add>, %20, %cst_17 [1] : vector<16x64xf32> to vector<16xf32>
    %22 = vector.shape_cast %21 : vector<16xf32> to vector<16x1xf32>
    %23 = arith.addf %19, %22 : vector<16x1xf32>
    %c0_18 = arith.constant 0 : index
    %c0_19 = arith.constant 0 : index
    %24 = vector.load %arg8[%c0_18, %c0_19] : memref<16x1xf32, #tpu.memory_space<vmem>>, vector<16x1xf32>
    tpu.vector_store %arg8[%c0_18, %c0_19], %23 {strides = array<i32>} : memref<16x1xf32, #tpu.memory_space<vmem>>, vector<16x1xf32>,
    %25 = arith.index_cast %arg2 : i32 to index
    %c0_20 = arith.constant 0 : index
    %c0_21 = arith.constant 0 : index
    %26 = vector.load %arg6[%25, %c0_20, %c0_21] : memref<1x16x64xf32, #tpu.memory_space<vmem>>, vector<1x16x64xf32>
    %27 = vector.shape_cast %26 : vector<1x16x64xf32> to vector<16x64xf32>
    %28 = vector.shape_cast %13 : vector<16x64xf32> to vector<1x16x64xf32>
    tpu.vector_store %arg6[%25, %c0_20, %c0_21], %28 {strides = array<i32>} : memref<1x16x64xf32, #tpu.memory_space<vmem>>, vector<1x16x64xf32>,
    %c0_i32_22 = arith.constant 0 : i32
    %29 = arith.cmpi eq, %arg2, %c0_i32_22 : i32
    %30 = arith.extui %29 : i1 to i32
    %c0_i32_23 = arith.constant 0 : i32
    %31 = arith.cmpi ne, %30, %c0_i32_23 : i32
    scf.if %31 {
      %c0_24 = arith.constant 0 : index
      %c0_25 = arith.constant 0 : index
      %32 = vector.load %arg7[%c0_24, %c0_25] : memref<16x1xf32, #tpu.memory_space<vmem>>, vector<16x1xf32>
      %cst_26 = arith.constant 1.562500e-02 : f32
      %33 = vector.broadcast %cst_26 : f32 to vector<16x1xf32>
      %34 = arith.mulf %32, %33 : vector<16x1xf32>
      %c0_27 = arith.constant 0 : index
      %c0_28 = arith.constant 0 : index
      %35 = vector.load %arg8[%c0_27, %c0_28] : memref<16x1xf32, #tpu.memory_space<vmem>>, vector<16x1xf32>
      %cst_29 = arith.constant 1.562500e-02 : f32
      %36 = vector.broadcast %cst_29 : f32 to vector<16x1xf32>
      %37 = arith.mulf %35, %36 : vector<16x1xf32>
      %38 = arith.mulf %34, %34 : vector<16x1xf32>
      %39 = arith.subf %37, %38 : vector<16x1xf32>
      %cst_30 = arith.constant 0.000000e+00 : f32
      %40 = vector.broadcast %cst_30 : f32 to vector<16x1xf32>
      %41 = arith.maximumf %39, %40 : vector<16x1xf32>
      %cst_31 = arith.constant 9.99999974E-6 : f32
      %42 = vector.broadcast %cst_31 : f32 to vector<16x1xf32>
      %43 = arith.addf %41, %42 : vector<16x1xf32>
      %44 = math.rsqrt %43 : vector<16x1xf32>
      %c0_32 = arith.constant 0 : index
      %c0_33 = arith.constant 0 : index
      %c0_34 = arith.constant 0 : index
      %45 = vector.load %arg6[%c0_32, %c0_33, %c0_34] : memref<1x16x64xf32, #tpu.memory_space<vmem>>, vector<1x16x64xf32>
      %46 = vector.shape_cast %45 : vector<1x16x64xf32> to vector<16x64xf32>
      %47 = vector.broadcast %34 : vector<16x1xf32> to vector<16x64xf32>
      %48 = arith.subf %46, %47 : vector<16x64xf32>
      %49 = vector.broadcast %44 : vector<16x1xf32> to vector<16x64xf32>
      %50 = arith.mulf %48, %49 : vector<16x64xf32>
      %cst_35 = arith.constant 0.000000e+00 : f32
      %51 = vector.broadcast %cst_35 : f32 to vector<16x64xf32>
      %52 = arith.cmpf oge, %50, %51 : vector<16x64xf32>
      %cst_36 = arith.constant 2.000000e-01 : f32
      %53 = vector.broadcast %cst_36 : f32 to vector<16x64xf32>
      %54 = arith.mulf %53, %50 : vector<16x64xf32>
      %55 = arith.select %52, %50, %54 : vector<16x64xi1>, vector<16x64xf32>
      %c0_37 = arith.constant 0 : index
      %c0_38 = arith.constant 0 : index
      %c0_39 = arith.constant 0 : index
      %56 = vector.load %arg5[%c0_37, %c0_38, %c0_39] : memref<1x16x64xf32, #tpu.memory_space<vmem>>, vector<1x16x64xf32>
      %57 = vector.shape_cast %56 : vector<1x16x64xf32> to vector<16x64xf32>
      %58 = vector.shape_cast %55 : vector<16x64xf32> to vector<1x16x64xf32>
      tpu.vector_store %arg5[%c0_37, %c0_38, %c0_39], %58 {strides = array<i32>} : memref<1x16x64xf32, #tpu.memory_space<vmem>>, vector<1x16x64xf32>,
    } else {
    }
    return
  }
  func.func @transform_0(%arg0: i32, %arg1: i32, %arg2: i32) -> (i32, i32, i32, i32) {
    %c0_i32 = arith.constant 0 : i32
    %c0_i32_0 = arith.constant 0 : i32
    %c0_i32_1 = arith.constant 0 : i32
    return %arg0, %arg2, %c0_i32, %c0_i32_0 : i32, i32, i32, i32
  }
  func.func @transform_1(%arg0: i32, %arg1: i32, %arg2: i32) -> (i32, i32, i32) {
    %c0_i32 = arith.constant 0 : i32
    %c0_i32_0 = arith.constant 0 : i32
    %c0_i32_1 = arith.constant 0 : i32
    return %c0_i32, %arg1, %c0_i32_0 : i32, i32, i32
  }
  func.func @transform_2(%arg0: i32, %arg1: i32, %arg2: i32) -> (i32, i32, i32) {
    %c0_i32 = arith.constant 0 : i32
    %c0_i32_0 = arith.constant 0 : i32
    return %arg0, %arg1, %c0_i32 : i32, i32, i32
  }
}

</mosaic_0001>

<bundles_post_ra>
// kernel: tpu_custom_call.1
= control target key start
LH: loop header
LB: loop body
LE: loop exit
PB: predicated region body
PF: predicated region fallthrough
CT: control target
= control target key end

     0   :  { %7 = vsyncpa [#allocation6], 0  ;;  %s1011_s0 = inlined_call_operand.hbm [shape: f32[2,1,32,72], index: 0, kind: input, shape index: {}]   ;;  %s1012_s1 = inlined_call_operand.hbm [shape: f32[2,16,32], index: 1, kind: input, shape index: {}]   ;;  %s1013_s2 = inlined_call_operand.hbm [shape: f32[2,16,64], index: 2, kind: output, shape index: {}]  }
   0x1   :  { %9 = vsyncpa [#allocation6 + $0x1], 0 }
   0x2   :  { %10 = vsyncpa [#allocation9], 0 }
   0x3   :  { %11 = vsyncpa [#allocation7], 0 }
   0x4   :  { %13 = vsyncpa [#allocation7 + $0x1], 0  ;;  %s835_s9 = smov 0   ;;  %s837_s10 = smov 0  }
   0x5   :  { %s839_s11 = smov 0   ;;  %s841_s12 = smov 0  }
   0x6   :  { %s843_s13 = smov 0   ;;  %s845_s14 = smov 0  }
   0x7 LB: > { %s536_s15 = sadd.s32 4294967295, %s810_s14   ;;  %s537_s16 = sadd.s32 4294967294, %s810_s14   ;;  %s810_s14 = sphi %s845_s14, %s19_s14   ;;  %s806_s13 = sphi %s843_s13, %s1025_s13   ;;  %s802_s12 = sphi %s841_s12, %s1024_s12   ;;  %s798_s11 = sphi %s839_s11, %s1023_s11   ;;  %s794_s10 = sphi %s837_s10, %s1022_s10   ;;  %s790_s9 = sphi %s835_s9, %s1021_s9  }
   0x8   : > { %p60_p0 = scmp.ne.s32.totalorder %s794_s10, %s790_s9  ;;  %p869_p1 = scmp.eq.s32.totalorder %s536_s15, 0 }
   0x9   : > { %p873_p2 = scmp.eq.s32.totalorder %s536_s15, 1  ;;  %p118_p3 = scmp.eq.s32.totalorder %s537_s16, 1 }
   0xa   : > { %p879_p4 = por %p869_p1, %p60_p0  ;;  %p538_p5 = scmp.ge.s32.totalorder %s810_s14, 1 }
   0xb   : > { %p884_p6 = por %p118_p3, %p60_p0  ;;  %p125_p7 = scmp.lt.s32.totalorder %s810_s14, 3 }
   0xc   : > { %s139_s23 = sshll.u32 %s1012_s1, 4  ;;  %s812_s25 = smov [#allocation8]   ;;  %s140_s23 = int_to_ptr.hbm [resolvable:$true] %s139_s23 }
   0xd   : > { %p892_p8 = pnand %p538_p5, %p125_p7  ;;  %s141_s26 = sshll.u32 %s812_s25, 4  ;;  %s142_s26 = int_to_ptr.vmem [resolvable:$true] %s141_s26 }
   0xe   : > { %p540_p11 = scmp.ge.s32.totalorder %s810_s14, 2  ;;  %s813_s27 = smov 128  }
   0xf   : > { %p575_p9 = pneg %p892_p8  ;;  %s814_s28 = smov 8  }
  0x10   : > { %s38_s29 = sadd.s32 1, %s806_s13  ;;  %s47_s30 = sadd.s32 1, %s798_s11 }
  0x11   : > { %p576_p10 = pnand %p575_p9, %p869_p1  ;;  %p40_p12 = scmp.ge.s32.totalorder %s38_s29, 2 }
  0x12   : > { %p54_p13 = scmp.ne.s32.totalorder %s798_s11, %s794_s10  ;;  %p55_p0 = scmp.eq.s32.totalorder %s810_s14, 0 }
  0x13   : > { %578 = dma.hbm_to_vmem [thread:$0]  (!%p576_p10), %s140_s23, 512, %s142_s26, [#allocation9], %s813_s27, %s813_s27, %s814_s28  }
  0x14   : > { %s1027_s29 = smov (%p40_p12, %s38_s29), 0  ;;  %p911_p3 = por %p55_p0, %p54_p13 }
  0x15   : > { %p917_p5 = por %p873_p2, %p54_p13  ;;  %s42_s5 = ssub.s32 %s806_s13, %s1027_s29 }
  0x16   : > { %p588_p7 = scmp.lt.s32.totalorder %s810_s14, 2  ;;  %p45_p9 = scmp.eq.s32.totalorder %s42_s5, 0 }
  0x17   : > { %s155_s6 = sand.u32 1, %s798_s11   ;;  %s557_s15 = sshll.u32 %s806_s13, 5 }
  0x18   : > { %s541_s7 = sshll.u32 %s155_s6, 5  ;;  %s166_s22 = scalar_lea.hbm %s1011_s0, %s557_s15 }
  0x19   : > { %s926_s8 = scalar_select %p45_p9, %s798_s11, %s47_s30  }
  0x1a   : > { %s159_s23 = scalar_lea.vmem [#allocation5], %s541_s7  ;;  %s167_s18 = sshll.u32 %s166_s22, 4  ;;  %s168_s18 = int_to_ptr.hbm [resolvable:$true] %s167_s18 }
  0x1b   : > { %s169_s25 = sshll.u32 %s159_s23, 4  ;;  %p580_p2 = pnand %p588_p7, %p911_p3  ;;  %s170_s25 = int_to_ptr.vmem [resolvable:$true] %s169_s25 }
  0x1c   : > { %s156_s26 = scalar_lea.sflag [#allocation6], %s155_s6  ;;  %181 = sbr.rel (%p892_p8) target bundleno = 582 (0x246), region = 28 }
  0x1d   : > { %582 = dma.hbm_to_vmem [thread:$0]  (!%p580_p2), %s168_s18, 512, %s170_s25, %s156_s26, %s813_s27, %s813_s27, %s814_s28  }
  0x1e   : > { %s940_s30 = sand.u32 (!%p892_p8), 1, %s794_s10  }
  0x1f   : > { %s545_s5 = sshll.u32 (!%p892_p8), %s940_s30, 5  ;;  %s184_s7 = scalar_lea.sflag (!%p892_p8), [#allocation6], %s940_s30 }
  0x20   : > { %s187_s15 = scalar_lea.vmem (!%p892_p8), [#allocation5], %s545_s5 }
  0x21   : > { %777 = dma.done.wait (%p879_p4), %s184_s7, 512  }
  0x22   : > { %779 = vsyncadd (%p879_p4), %s184_s7, 4294966784 }
  0x23   : > { %781 = dma.done.wait (%p869_p1), [#allocation9], 512  }
  0x24   : > { %783 = vsyncadd (%p869_p1), [#allocation9], 4294966784  ;;  %v227_v0 = vld [vmem:[%s187_s15 + $0x10] sm:$0xff]  ;;  %v228_v1 = vld [vmem:[%s187_s15 + $0x18] sm:$0xff]  ;;  %s815_s24 = smov 120   ;;  %vm250_vm0 = vcmask 261120  }
  0x25   : > { %v647_v2 = vpack.i.bf16 %v227_v0, %v228_v1  ;;  %298 = vmatpush.msra.mxu1 %v228_v1  ;;  %563 = vmatpush.msra.mxu3 %v228_v1  ;;  %v225_v3 = vld [vmem:[%s187_s15] sm:$0xff]  ;;  %v226_v4 = vld [vmem:[%s187_s15 + $0x8] sm:$0xff]  ;;  %v232_v14 = vld [vmem:[#allocation8 + $0x10] sm:$0xff]  ;;  %vm220_vm1 = vcmask 7168   ;;  %v816_v16 = vmov 0.0   ;;  %vm311_vm2 = vcmask 523264  }
  0x26   : > { %v652_v5 = vpack.i.bf16 %v225_v3, %v226_v4  ;;  %v229_v6 = vld [vmem:[#allocation8] sm:$0xff]  ;;  %v230_v7 = vld [vmem:[#allocation8 + $0x8] sm:$0xff]  ;;  %v233_v15 = vld [vmem:[#allocation8 + $0x18] sm:$0xff]  ;;  %221 = vst.msk [vmem:[#allocation3] sm:$0xff] %vm220_vm1, %v816_v16  ;;  %v817_v29 = vmov 0   ;;  %s547_s17 = sshll.u32 %s940_s30, 4 }
  0x27   : > { %648 = vrot.lane.b32.xlu0 %v647_v2, %s815_s24  ;;  %299 = vmatpush.msra.mxu1 %v227_v0  ;;  %222 = vst.msk [vmem:[#allocation3 + $0x8] sm:$0xff] %vm220_vm1, %v816_v16  ;;  %s213_s19 = scalar_lea.vmem [#allocation10], %s547_s17  ;;  %s558_s27 = sshll.u32 %s802_s12, 4 }
  0x28   : > { %564 = vmatpush.msra.mxu3 %v227_v0  ;;  %223 = vst.msk [vmem:[#allocation4] sm:$0xff] %vm220_vm1, %v816_v16  ;;  %657 = vset.pattern.permute.xlu0 %v817_v29  ;;  %s428_s6 = scalar_lea.hbm %s1013_s2, %s558_s27  ;;  %s429_s16 = sshll.u32 %s213_s19, 4  ;;  %s430_s16 = int_to_ptr.vmem [resolvable:$true] %s429_s16 }
  0x29   : > { %300 = vmatpush.msra.mxu1 %v226_v4  ;;  %224 = vst.msk [vmem:[#allocation4 + $0x8] sm:$0xff] %vm220_vm1, %v816_v16  ;;  %658 = vset.pattern.permute.xlu1 %v817_v29  ;;  %s431_s21 = sshll.u32 %s428_s6, 4  ;;  %s415_s12 = scalar_lea.sflag [#allocation7], %s940_s30  ;;  %s432_s21 = int_to_ptr.hbm [resolvable:$true] %s431_s21 }
  0x2a   : > { %565 = vmatpush.msra.mxu3 %v226_v4  ;;  %659 = vset.pattern.permute.xlu2 %v817_v29  ;;  %s738_s22 = sshra.s32 %s432_s21, 4  ;;  %s744_s26 = scalar_lea.hbm %s1013_s2, 32  ;;  %s739_s22 = int_to_ptr.hbm [resolvable:$true] %s738_s22 }
  0x2b   : > { %301 = vmatpush.msra.mxu1 %v225_v3  ;;  %s740_s23 = scalar_lea.hbm %s739_s22, 16  ;;  %p745_p10 = scmp.lt.s32.totalorder %s739_s22, %s1013_s2 }
  0x2c   : > { %566 = vmatpush.msra.mxu3 %v225_v3  ;;  %550 = vmatmul.msk.f32.vlgmr.msra.gmra.mxu1 %vm250_vm0, %v229_v6  ;;  %p741_p1 = scmp.ne.s32.totalorder %s739_s22, %s740_s23  ;;  %p746_p12 = scmp.lt.s32.totalorder %s744_s26, %s740_s23 }
  0x2d   : > { %551 = vmatmul.msk.f32.vlgmr.msra.gmra.mxu3 %vm250_vm0, %v230_v7  ;;  %v309_v30 = vld [vmem:[#allocation3] sm:$0xff] }
  0x2e   : > { %v310_v36 = vld [vmem:[#allocation3 + $0x8] sm:$0xff]  ;;  %p742_p4 = pnand %p741_p1, %p917_p5  ;;  %p747_p13 = por %p746_p12, %p745_p10 }
  0x2f   : > { %653 = vrot.lane.b32.xlu0 %v652_v5, %s815_s24  ;;  %v323_v32 = vld [vmem:[#allocation4] sm:$0xff] }
  0x30   : > { %v324_v38 = vld [vmem:[#allocation4 + $0x8] sm:$0xff]  ;;  %p743_p8 = pneg %p742_p4 }
  0x32   : > { %p748_p0 = pnand %p747_p13, %p743_p8 }
  0x99   : > { %v649_v8 = vpop.permute.xlu0 %648 }
  0x9a   : > { %v650_v9 = vunpack.i.l.bf16 %v649_v8  ;;  %v651_v10 = vunpack.i.h.bf16 %v649_v8 }
  0x9c   : > { %269 = vmatpush.msra.mxu0 %v650_v9  ;;  %559 = vmatpush.msra.mxu2 %v650_v9 }
  0x9e   : > { %270 = vmatpush.msra.mxu0 %v651_v10  ;;  %560 = vmatpush.msra.mxu2 %v651_v10 }
  0xa1   : > { %v654_v11 = vpop.permute.xlu0 %653 }
  0xa2   : > { %v655_v12 = vunpack.i.l.bf16 %v654_v11  ;;  %v656_v13 = vunpack.i.h.bf16 %v654_v11 }
  0xa4   : > { %271 = vmatpush.msra.mxu0 %v655_v12  ;;  %561 = vmatpush.msra.mxu2 %v655_v12 }
  0xa6   : > { %272 = vmatpush.msra.mxu0 %v656_v13  ;;  %562 = vmatpush.msra.mxu2 %v656_v13 }
  0xa7   : > { %548 = vmatmul.msk.f32.vlgmr.msra.gmra.mxu0 %vm250_vm0, %v232_v14  ;;  %549 = vmatmul.msk.f32.vlgmr.msra.gmra.mxu2 %vm250_vm0, %v233_v15 }
  0xa9   : > { %v303_v17 = vpop.f32.mrf.mxu1 }
  0xb0   : > { %v306_v22 = vpop.f32.mrf.mxu3 }
 0x124   : > { %v274_v18 = vpop.f32.mrf.mxu0 }
 0x125   : > { %v304_v19 = vadd.f32 %v303_v17, %v274_v18 }
 0x127   : > { %339 = vst.msk [vmem:[#allocation2] sm:$0xff] %vm311_vm2, %v304_v19  ;;  %v312_v20 = vsel %vm311_vm2, %v304_v19, 0.0  ;;  %v325_v21 = vmul.f32 %v304_v19, %v304_v19 }
 0x128   : > { %313 = vadd.xlane.f32.xlu1 %v312_v20 }
 0x129   : > { %v327_v23 = vsel %vm311_vm2, %v325_v21, 0.0 }
 0x12a   : > { %328 = vadd.xlane.f32.xlu2 %v327_v23  ;;  %v277_v24 = vpop.f32.mrf.mxu2 }
 0x12b   : > { %v307_v25 = vadd.f32 %v306_v22, %v277_v24 }
 0x12d   : > { %340 = vst.msk [vmem:[#allocation2 + $0x8] sm:$0xff] %vm311_vm2, %v307_v25  ;;  %v315_v26 = vsel %vm311_vm2, %v307_v25, 0.0  ;;  %v326_v27 = vmul.f32 %v307_v25, %v307_v25 }
 0x12e   : > { %v380_v8 = vld [vmem:[#allocation2] sm:$0xff] }
 0x12f   : > { %v330_v28 = vsel %vm311_vm2, %v326_v27, 0.0 }
 0x130   : > { %316 = vadd.xlane.f32.xlu1 %v315_v26 }
 0x132   : > { %331 = vadd.xlane.f32.xlu2 %v330_v28 }
 0x134   : > { %v381_v16 = vld [vmem:[#allocation2 + $0x8] sm:$0xff] }
 0x19b   : > { %v314_v31 = vpop.xlane.xlu1 %313 }
 0x19c   : > { %v318_v33 = vadd.f32 %v314_v31, %v309_v30 }
 0x19d   : > { %v329_v34 = vpop.xlane.xlu2 %328 }
 0x19e   : > { %321 = vst.msk [vmem:[#allocation3] sm:$0xff] %vm220_vm1, %v318_v33  ;;  %v333_v35 = vadd.f32 %v329_v34, %v323_v32 }
 0x1a0   : > { %335 = vst.msk [vmem:[#allocation4] sm:$0xff] %vm220_vm1, %v333_v35 }
 0x1a3   : > { %v317_v37 = vpop.xlane.xlu1 %316 }
 0x1a4   : > { %v319_v39 = vadd.f32 %v317_v37, %v310_v36 }
 0x1a5   : > { %v332_v40 = vpop.xlane.xlu2 %331  ;;  %v344_v41 = vld [vmem:[#allocation3] sm:$0xff] }
 0x1a6   : > { %322 = vst.msk [vmem:[#allocation3 + $0x8] sm:$0xff] %vm220_vm1, %v319_v39  ;;  %v334_v42 = vadd.f32 %v332_v40, %v324_v38  ;;  %v346_v43 = vmul.f32 0.015625, %v344_v41 }
 0x1a7   : > { %v348_v44 = vld [vmem:[#allocation4] sm:$0xff] }
 0x1a8   : > { %336 = vst.msk [vmem:[#allocation4 + $0x8] sm:$0xff] %vm220_vm1, %v334_v42  ;;  %v350_v45 = vmul.f32 0.015625, %v348_v44  ;;  %384 = vperm.xlu0 %657, %v346_v43   ;;  %v352_v46 = vmul.f32 %v346_v43, %v346_v43 }
 0x1aa   : > { %v354_v47 = vsub.f32 %v350_v45, %v352_v46 }
 0x1ac   : > { %v356_v48 = vmax.f32 %v354_v47, 0.0 }
 0x1ad   : > { %v345_v49 = vld [vmem:[#allocation3 + $0x8] sm:$0xff] }
 0x1ae   : > { %v358_v50 = vadd.f32 1e-05, %v356_v48  ;;  %v347_v51 = vmul.f32 0.015625, %v345_v49 }
 0x1af   : > { %v349_v52 = vld [vmem:[#allocation4 + $0x8] sm:$0xff] }
 0x1b0   : > { %660 = vrsqrt.f32 %v358_v50  ;;  %v351_v53 = vmul.f32 0.015625, %v349_v52  ;;  %389 = vperm.xlu1 %658, %v347_v51   ;;  %v353_v54 = vmul.f32 %v347_v51, %v347_v51  ;;  %vm366_vm4 = vweird.f32 %v358_v50 }
 0x1b2   : > { %v355_v55 = vsub.f32 %v351_v53, %v353_v54 }
 0x1b4   : > { %v357_v56 = vmax.f32 %v355_v55, 0.0 }
 0x1b6   : > { %v661_v57 = vpop.eup %660  ;;  %v359_v58 = vadd.f32 1e-05, %v357_v56 }
 0x1b7   : > { %v361_v59 = vmul.f32 %v661_v57, %v358_v50  ;;  %vm367_vm3 = vweird.f32 %v661_v57 }
 0x1b8   : > { %662 = vrsqrt.f32 %v359_v58  ;;  %vm368_vm5 = vmor %vm366_vm4, %vm367_vm3  ;;  %vm376_vm7 = vweird.f32 %v359_v58 }
 0x1b9   : > { %v362_v60 = vmul.f32 %v661_v57, %v361_v59 }
 0x1bb   : > { %v363_v61 = vmul.f32 0.5, %v362_v60 }
 0x1bd   : > { %v364_v62 = vsub.f32 1.5, %v363_v61 }
 0x1be   : > { %v663_v63 = vpop.eup %662 }
 0x1bf   : > { %v365_v0 = vmul.f32 %v661_v57, %v364_v62  ;;  %v371_v1 = vmul.f32 %v663_v63, %v359_v58  ;;  %vm377_vm6 = vweird.f32 %v663_v63 }
 0x1c0   : > { %vm378_vm8 = vmor %vm376_vm7, %vm377_vm6 }
 0x1c1   : > { %v369_v2 = vsel %vm368_vm5, %v661_v57, %v365_v0  ;;  %v372_v3 = vmul.f32 %v663_v63, %v371_v1 }
 0x1c2   : > { %396 = vperm.xlu2 %659, %v369_v2  }
 0x1c3   : > { %v373_v4 = vmul.f32 0.5, %v372_v3 }
 0x1c5   : > { %v374_v5 = vsub.f32 1.5, %v373_v4 }
 0x1c7   : > { %v375_v6 = vmul.f32 %v663_v63, %v374_v5 }
 0x1c9   : > { %v379_v7 = vsel %vm378_vm8, %v663_v63, %v375_v6 }
 0x1ca   : > { %401 = vperm.xlu0 %657, %v379_v7  }
 0x21a   : > { %v385_v9 = vpop.permute.xlu0 %384 }
 0x21b   : > { %v392_v10 = vsub.f32 %v380_v8, %v385_v9 }
 0x21c   : > { %v397_v11 = vpop.permute.xlu2 %396 }
 0x21d   : > { %v404_v12 = vmul.f32 %v397_v11, %v392_v10 }
 0x21f   : > { %vm406_vm9 = vcmp.ge.f32.partialorder %v404_v12, 0.0  ;;  %v408_v13 = vmul.f32 0.2, %v404_v12 }
 0x221   : > { %v410_v14 = vsel %vm406_vm9, %v404_v12, %v408_v13 }
 0x222   : > { %412 = vst.msk [vmem:[%s213_s19] sm:$0xff] %vm311_vm2, %v410_v14  ;;  %v390_v15 = vpop.permute.xlu1 %389 }
 0x223   : > { %v393_v17 = vsub.f32 %v381_v16, %v390_v15 }
 0x23c   : > { %v402_v18 = vpop.permute.xlu0 %401 }
 0x23d   : > { %v405_v19 = vmul.f32 %v402_v18, %v393_v17 }
 0x23f   : > { %vm407_vm10 = vcmp.ge.f32.partialorder %v405_v19, 0.0  ;;  %v409_v20 = vmul.f32 0.2, %v405_v19 }
 0x241   : > { %v411_v21 = vsel %vm407_vm10, %v405_v19, %v409_v20 }
 0x242   : > { %413 = vst.msk [vmem:[%s213_s19 + $0x8] sm:$0xff] %vm311_vm2, %v411_v21 }
 0x243   : > { %751 = shalt.err (!%p748_p0)
}
 0x244   : > { %s818_s30 = smov 128   ;;  %s819_s15 = smov 8  }
 0x245   : > { %573 = dma.vmem_to_hbm [thread:$0]  (%p917_p5), %s430_s16, 256, %s432_s21, %s415_s12, %s818_s30, %s818_s30, %s819_s15  }
 0x246 PF: > { %s446_s24 = sand.u32 1, %s790_s9   ;;  %p584_p3 = pnand %p540_p11, %p884_p6 }
 0x247   : > { %s447_s17 = scalar_lea.sflag [#allocation7], %s446_s24 }
 0x248   : > { %p585_p7 = pneg %p584_p3 }
 0x24a   : > { %785 = dma.done.wait (%p585_p7), %s447_s17, 256  }
 0x24b   : > { %787 = vsyncadd (%p585_p7), %s447_s17, 4294967040  ;;  %s19_s14 = sadd.s32 1, %s810_s14   ;;  %s1021_s9 = smov %s794_s10 }
 0x24c   : > { %p16_p9 = scmp.ge.s32.totalorder %s19_s14, 4   ;;  %s1022_s10 = smov %s798_s11 }
 0x24d   : > { %s1023_s11 = smov %s926_s8  ;;  %s1024_s12 = smov %s806_s13 }
 0x24e   : > { %s1025_s13 = smov %s1027_s29  ;;  %18 = sbr.rel (!%p16_p9) target bundleno = 7 (0x7), region = 88 }
 0x253   :  { %453 = vsyncpa [#allocation6], 1 }
 0x254   :  { %455 = vsyncpa [#allocation6 + $0x1], 1 }
 0x255   :  { %456 = vsyncpa [#allocation9], 1 }
 0x256   :  { %457 = vsyncpa [#allocation7], 1 }
 0x257   :  { %459 = vsyncpa [#allocation7 + $0x1], 1 }

</bundles_post_ra>
